<compile_context>
chip_gen: v7x
topology: tpu7x:2x2x1
jax: 0.10.0
libtpu: 0.0.40
codegen_flags: <defaults>
</compile_context>

<pallas_src>
import functools
import math

import jax
import jax.numpy as jnp
from jax import lax
from jax.experimental import pallas as pl
from jax.experimental.pallas import tpu as pltpu


def _round_up(x, m):
    return ((x + m - 1) // m) * m


def _conv1d_mm_kernel(x0_ref, x1_ref, w_ref, b_ref, o_ref, *, K):
    """One lane tile of the flattened, polyphase-decimated conv.

    x0_ref : (Cin_pad, TN)     current lane tile of the flat input slab (bf16)
    x1_ref : (Cin_pad, TN)     next lane tile (halo source for the K-1 tap shifts)
    w_ref  : (K, OC, Cin_pad)  per-tap weight matrices (bf16)
    b_ref  : (OC, 1)           bias (f32)
    o_ref  : (OC, TN)          lane-dense output tile (f32)
    """
    oc, tn = o_ref.shape
    # 2-tile halo window: only 2x the tile, NOT the K-fold im2col copy of the previous rev.
    if K > 1:
        xwin = jnp.concatenate([x0_ref[...], x1_ref[...]], axis=1)   # (Cin_pad, 2*TN)
    else:
        xwin = x0_ref[...]
    # Bias folded into the accumulator init (no separate VPU add after the matmuls).
    acc = jnp.broadcast_to(b_ref[...], (oc, tn)).astype(jnp.float32)
    # K accumulated MXU matmuls (f32 accumulation); the x window is read once per tap,
    # no intermediate (K*Cin, TN) buffer through the store/load slots.
    for k in range(K):
        acc = acc + jnp.dot(w_ref[k], xwin[:, k:k + tn],
                            preferred_element_type=jnp.float32)
    o_ref[...] = acc.astype(o_ref.dtype)


def flex_conv1d(x, weight, bias, *, padding=0, stride=1, lane_tile=512,
                compute_dtype=jnp.bfloat16):
    """FlexConv1d.forward: flatten leading dims, Conv1d over (C, T), restore leading dims.

    Lowered as one fused lane-dense matmul:
      * leading dims folded into the batch, batch folded into the lane axis,
      * stride folded away by a polyphase (pre-decimated) layout,
      * K taps -> K accumulated (OC, Cin) x (Cin, TN) MXU matmuls,
      * x streams through VMEM one lane tile at a time (+ the next tile as halo).
    """
    *lead, IC, T = x.shape
    B = math.prod(lead) if lead else 1
    OC, w_ic, K = weight.shape
    assert w_ic == IC
    assert stride >= 1 and padding >= 0
    T_pad = T + 2 * padding
    assert T_pad >= K
    T_out = (T_pad - K) // stride + 1

    s = stride
    Kp = -(-K // s)                      # taps per polyphase branch (== K when stride == 1)
    Cin = IC * s                         # polyphase virtual channels (== IC when stride == 1)
    L = T_out + Kp - 1                   # per-batch slot length in lanes (== T_pad, stride 1)
    T_ext = L * s                        # padded input samples consumed per batch slot

    align = 8 if jnp.dtype(compute_dtype).itemsize == 4 else 16
    Cin_pad = _round_up(Cin, align)      # bf16 sublane packing -> multiples of 16
    TN = int(lane_tile)                  # lane-dense tile (sweep 256-512 on v7x, 512 on v5e/v6e)
    assert TN % 128 == 0 and Kp <= TN

    n_cols = B * L                       # batch folded into the lane axis
    num_tiles = pl.cdiv(n_cols, TN)
    W_out = num_tiles * TN               # lane-dense padded output width
    W_in = (num_tiles + 1) * TN          # one extra tile so the (i+1) halo tile always exists

    # ---- input layout (done in bf16 to halve the HBM traffic of the plumbing) ------------
    xq = x.reshape(B, IC, T).astype(compute_dtype)
    # Single time-axis pad merging the conv zero padding and the layout padding.
    right = max(0, T_ext - T - padding)
    xq = jnp.pad(xq, ((0, 0), (0, 0), (padding, right)))[:, :, :T_ext]   # (B, IC, T_ext)
    # Polyphase split: virtual channel (p, ic) at lane m holds x_padded[ic, m*s + p].
    xq = xq.reshape(B, IC, L, s)
    xq = jnp.transpose(xq, (3, 1, 0, 2)).reshape(Cin, n_cols)            # (Cin, B*L)
    xlay = jnp.pad(xq, ((0, Cin_pad - Cin), (0, W_in - n_cols)))         # (Cin_pad, W_in)

    # ---- weight layout: (OC, IC, K) -> (Kp, OC, Cin_pad), tap-major -----------------------
    wq = jnp.pad(weight, ((0, 0), (0, 0), (0, Kp * s - K)))              # (OC, IC, Kp*s)
    wq = wq.reshape(OC, IC, Kp, s)
    wq = jnp.transpose(wq, (2, 0, 3, 1)).reshape(Kp, OC, Cin)            # (tap, OC, (p, ic))
    w3 = jnp.pad(wq, ((0, 0), (0, 0), (0, Cin_pad - Cin))).astype(compute_dtype)
    bias2 = bias.reshape(OC, 1).astype(jnp.float32)

    kernel = functools.partial(_conv1d_mm_kernel, K=Kp)

    # ---- VMEM budget from the actual blocks (v7x has only 64 MiB physical VMEM/TC) --------
    ib = jnp.dtype(compute_dtype).itemsize
    xbytes = Cin_pad * TN * ib                       # one streamed x tile
    wbytes = Kp * OC * max(Cin_pad, 128) * ib        # constant weights (lane padded)
    obytes = OC * TN * 4                             # one output tile (f32)
    est = (2 * 2 * xbytes            # two x inputs, double-buffered
           + wbytes + OC * 4         # single-buffered constants
           + 2 * obytes              # double-buffered output
           + 2 * xbytes + obytes)    # in-kernel window + accumulator
    vmem_limit = int(min(48 * 1024 * 1024, max(4 * 1024 * 1024, 2 * est)))

    out_flat = pl.pallas_call(
        kernel,
        out_shape=jax.ShapeDtypeStruct((OC, W_out), jnp.float32),
        grid=(num_tiles,),
        in_specs=[
            pl.BlockSpec((Cin_pad, TN), lambda i: (0, i)),          # streamed x tile i
            pl.BlockSpec((Cin_pad, TN), lambda i: (0, i + 1)),      # streamed x tile i+1 (halo)
            pl.BlockSpec((Kp, OC, Cin_pad), lambda i: (0, 0, 0),
                         pipeline_mode=pl.Buffered(1)),             # constant weights
            pl.BlockSpec((OC, 1), lambda i: (0, 0),
                         pipeline_mode=pl.Buffered(1)),             # constant bias
        ],
        out_specs=pl.BlockSpec((OC, TN), lambda i: (0, i)),          # lane-dense stores
        compiler_params=pltpu.CompilerParams(
            dimension_semantics=("parallel",),
            vmem_limit_bytes=vmem_limit),
    )(xlay, xlay, w3, bias2)

    # ---- output layout: crop kept positions, restore (..., OC, T_out) ----------------------
    # TODO(synk): if the consumer accepts (OC, B*T_out) layout, skip this crop/transpose pass.
    out = out_flat[:, :n_cols].reshape(OC, B, L)[:, :, :T_out]
    out = jnp.transpose(out, (1, 0, 2)).reshape(*lead, OC, T_out)
    return out


def _reference_conv1d(x2, weight, bias, padding, stride):
    y = lax.conv_general_dilated(
        x2, weight,
        window_strides=(stride,),
        padding=[(padding, padding)],
        dimension_numbers=("NCH", "OIH", "NCH"),
        precision=lax.Precision.HIGHEST,
    )
    return y + bias.reshape(1, -1, 1)


def _check(lead, IC, OC, K, T, padding, stride, key):
    kx, kw, kb = jax.random.split(key, 3)
    bound = 1.0 / (IC * K) ** 0.5
    weight = jax.random.uniform(kw, (OC, IC, K), jnp.float32, -bound, bound)
    bias = jax.random.uniform(kb, (OC,), jnp.float32, -bound, bound)
    x = jax.random.normal(kx, (*lead, IC, T), jnp.float32)

    y = flex_conv1d(x, weight, bias, padding=padding, stride=stride)
    y = jax.block_until_ready(y)

    # Reference on bf16-rounded inputs (the kernel computes in bf16 with f32 accumulation),
    # so the comparison isolates the kernel's accumulation rather than bf16 quantization.
    B = math.prod(lead) if lead else 1
    xq = x.astype(jnp.bfloat16).astype(jnp.float32)
    wq = weight.astype(jnp.bfloat16).astype(jnp.float32)
    y_ref = _reference_conv1d(xq.reshape(B, IC, T), wq, bias, padding, stride)
    y_ref = y_ref.reshape(*lead, OC, y_ref.shape[-1])

    assert y.shape == y_ref.shape, (y.shape, y_ref.shape)
    err = float(jnp.max(jnp.abs(y - y_ref)))
    assert err < 2e-3, err


if __name__ == "__main__":
    key = jax.random.PRNGKey(0)
    k1, k2 = jax.random.split(key)
    # FlexConv1d over the trailing (channels=4, time=16) dims with leading dims (2, 3).
    _check(lead=(2, 3), IC=4, OC=8, K=3, T=16, padding=1, stride=1, key=k1)
    # stride > 1 exercises the polyphase (pre-decimated) layout.
    _check(lead=(2, 3), IC=4, OC=8, K=3, T=16, padding=1, stride=2, key=k2)
    print("KERNEL_OK")
</pallas_src>

<mosaic_0001>
module attributes {stable_mosaic.version = 11 : i64} {
  func.func @_conv1d_mm_kernel(%arg0: i32, %arg1: memref<16x512xbf16, #tpu.memory_space<vmem>>, %arg2: memref<16x512xbf16, #tpu.memory_space<vmem>>, %arg3: memref<3x8x16xbf16, #tpu.memory_space<vmem>>, %arg4: memref<8x1xf32, #tpu.memory_space<vmem>>, %arg5: memref<8x512xf32, #tpu.memory_space<vmem>>) attributes {dimension_semantics = [#tpu.dimension_semantics<parallel>], iteration_bounds = array<i64: 1>, scalar_prefetch = 0 : i64, scratch_operands = 0 : i64, tpu.core_type = #tpu.core_type<tc>, window_params = [{transform_indices = @transform_0, window_bounds = array<i64: 16, 512>}, {transform_indices = @transform_1, window_bounds = array<i64: 16, 512>}, {pipeline_mode = #tpu.pipeline_mode<synchronous>, transform_indices = @transform_2, window_bounds = array<i64: 3, 8, 16>}, {pipeline_mode = #tpu.pipeline_mode<synchronous>, transform_indices = @transform_3, window_bounds = array<i64: 8, 1>}, {transform_indices = @transform_4, window_bounds = array<i64: 8, 512>}]} {
    %c0 = arith.constant 0 : index
    %c0_0 = arith.constant 0 : index
    %0 = vector.load %arg1[%c0, %c0_0] : memref<16x512xbf16, #tpu.memory_space<vmem>>, vector<16x512xbf16>
    %c0_1 = arith.constant 0 : index
    %c0_2 = arith.constant 0 : index
    %1 = vector.load %arg2[%c0_1, %c0_2] : memref<16x512xbf16, #tpu.memory_space<vmem>>, vector<16x512xbf16>
    %2 = tpu.concatenate %0, %1 in 1 : vector<16x512xbf16>, vector<16x512xbf16> -> vector<16x1024xbf16>
    %c0_3 = arith.constant 0 : index
    %c0_4 = arith.constant 0 : index
    %3 = vector.load %arg4[%c0_3, %c0_4] : memref<8x1xf32, #tpu.memory_space<vmem>>, vector<8x1xf32>
    %4 = vector.shape_cast %3 : vector<8x1xf32> to vector<8x1xf32>
    %5 = vector.broadcast %4 : vector<8x1xf32> to vector<8x512xf32>
    %c0_5 = arith.constant 0 : index
    %c0_6 = arith.constant 0 : index
    %c0_7 = arith.constant 0 : index
    %6 = vector.load %arg3[%c0_5, %c0_6, %c0_7] : memref<3x8x16xbf16, #tpu.memory_space<vmem>>, vector<1x8x16xbf16>
    %7 = vector.shape_cast %6 : vector<1x8x16xbf16> to vector<8x16xbf16>
    %8 = vector.extract_strided_slice %2 {offsets = [0, 0], sizes = [16, 512], strides = [1, 1]} : vector<16x1024xbf16> to vector<16x512xbf16>
    %cst = arith.constant dense<0.000000e+00> : vector<8x512xf32>
    %9 = tpu.matmul %7, %8, %cst {dimension_numbers = #tpu.dot_dimension_numbers<[1], [0], [0], [1], [0, 0, 1, 1], [], []>} : vector<8x16xbf16>, vector<16x512xbf16>, vector<8x512xf32> -> vector<8x512xf32>
    %10 = arith.addf %5, %9 : vector<8x512xf32>
    %c1 = arith.constant 1 : index
    %c0_8 = arith.constant 0 : index
    %c0_9 = arith.constant 0 : index
    %11 = vector.load %arg3[%c1, %c0_8, %c0_9] : memref<3x8x16xbf16, #tpu.memory_space<vmem>>, vector<1x8x16xbf16>
    %12 = vector.shape_cast %11 : vector<1x8x16xbf16> to vector<8x16xbf16>
    %13 = vector.extract_strided_slice %2 {offsets = [0, 1], sizes = [16, 512], strides = [1, 1]} : vector<16x1024xbf16> to vector<16x512xbf16>
    %cst_10 = arith.constant dense<0.000000e+00> : vector<8x512xf32>
    %14 = tpu.matmul %12, %13, %cst_10 {dimension_numbers = #tpu.dot_dimension_numbers<[1], [0], [0], [1], [0, 0, 1, 1], [], []>} : vector<8x16xbf16>, vector<16x512xbf16>, vector<8x512xf32> -> vector<8x512xf32>
    %15 = arith.addf %10, %14 : vector<8x512xf32>
    %c2 = arith.constant 2 : index
    %c0_11 = arith.constant 0 : index
    %c0_12 = arith.constant 0 : index
    %16 = vector.load %arg3[%c2, %c0_11, %c0_12] : memref<3x8x16xbf16, #tpu.memory_space<vmem>>, vector<1x8x16xbf16>
    %17 = vector.shape_cast %16 : vector<1x8x16xbf16> to vector<8x16xbf16>
    %18 = vector.extract_strided_slice %2 {offsets = [0, 2], sizes = [16, 512], strides = [1, 1]} : vector<16x1024xbf16> to vector<16x512xbf16>
    %cst_13 = arith.constant dense<0.000000e+00> : vector<8x512xf32>
    %19 = tpu.matmul %17, %18, %cst_13 {dimension_numbers = #tpu.dot_dimension_numbers<[1], [0], [0], [1], [0, 0, 1, 1], [], []>} : vector<8x16xbf16>, vector<16x512xbf16>, vector<8x512xf32> -> vector<8x512xf32>
    %20 = arith.addf %15, %19 : vector<8x512xf32>
    %c0_14 = arith.constant 0 : index
    %c0_15 = arith.constant 0 : index
    %21 = vector.load %arg5[%c0_14, %c0_15] : memref<8x512xf32, #tpu.memory_space<vmem>>, vector<8x512xf32>
    tpu.vector_store %arg5[%c0_14, %c0_15], %20 {strides = array<i32>} : memref<8x512xf32, #tpu.memory_space<vmem>>, vector<8x512xf32>,
    return
  }
  func.func @transform_0(%arg0: i32) -> (i32, i32) {
    %c0_i32 = arith.constant 0 : i32
    %c0_i32_0 = arith.constant 0 : i32
    return %c0_i32, %arg0 : i32, i32
  }
  func.func @transform_1(%arg0: i32) -> (i32, i32) {
    %c1_i32 = arith.constant 1 : i32
    %0 = arith.addi %arg0, %c1_i32 : i32
    %c0_i32 = arith.constant 0 : i32
    %c0_i32_0 = arith.constant 0 : i32
    return %c0_i32, %0 : i32, i32
  }
  func.func @transform_2(%arg0: i32) -> (i32, i32, i32) {
    %c0_i32 = arith.constant 0 : i32
    %c0_i32_0 = arith.constant 0 : i32
    %c0_i32_1 = arith.constant 0 : i32
    %c0_i32_2 = arith.constant 0 : i32
    return %c0_i32, %c0_i32_0, %c0_i32_1 : i32, i32, i32
  }
  func.func @transform_3(%arg0: i32) -> (i32, i32) {
    %c0_i32 = arith.constant 0 : i32
    %c0_i32_0 = arith.constant 0 : i32
    %c0_i32_1 = arith.constant 0 : i32
    return %c0_i32, %c0_i32_0 : i32, i32
  }
  func.func @transform_4(%arg0: i32) -> (i32, i32) {
    %c0_i32 = arith.constant 0 : i32
    %c0_i32_0 = arith.constant 0 : i32
    return %c0_i32, %arg0 : i32, i32
  }
}

</mosaic_0001>

<bundles_post_ra>
// kernel: tpu_custom_call.1
= control target key start
LH: loop header
LB: loop body
LE: loop exit
PB: predicated region body
PF: predicated region fallthrough
CT: control target
= control target key end

     0   :  { %9 = vsyncpa [#allocation3], 0  ;;  %s638_s0 = inlined_call_operand.hbm [shape: bf16[16,1024], index: 0, kind: input, shape index: {}]   ;;  %s639_s1 = inlined_call_operand.hbm [shape: bf16[16,1024], index: 1, kind: input, shape index: {}]   ;;  %s640_s2 = inlined_call_operand.vmem [shape: bf16[3,8,16], index: 2, kind: input, shape index: {}]   ;;  %s641_s3 = inlined_call_operand.vmem [shape: f32[8,1], index: 3, kind: input, shape index: {}]   ;;  %s642_s4 = inlined_call_operand.hbm [shape: f32[8,512], index: 4, kind: output, shape index: {}]  }
   0x1   :  { %10 = vsyncpa [#allocation6], 0 }
   0x2   :  { %11 = vsyncpa [#allocation4], 0  ;;  %s547_s15 = smov [#allocation2]   ;;  %s472_s19 = scalar_lea.hbm %s638_s0, 512 }
   0x3   :  { %s17_s16 = sshll.u32 %s547_s15, 4  ;;  %p473_p0 = scmp.ne.s32.totalorder %s638_s0, %s472_s19  ;;  %s18_s16 = int_to_ptr.vmem [resolvable:$true] %s17_s16 }
   0x4   :  { %s474_s24 = scalar_lea.hbm %s638_s0, 1024  ;;  %p476_p2 = scmp.lt.u32.totalorder %s472_s19, %s638_s0 }
   0x5   :  { %p475_p1 = scmp.lt.u32.totalorder %s474_s24, %s472_s19 }
   0x7   :  { %p477_p3 = por %p476_p2, %p475_p1 }
   0x9   :  { %p478_p4 = pnand %p477_p3, %p473_p0 }
   0xb   :  { %481 = shalt.err (!%p478_p4)
}
   0xc   :  { %s482_s27 = scalar_lea.vmem %s18_s16, 512  ;;  %p487_p6 = scmp.lt.s32.totalorder %s18_s16, %s18_s16 }
   0xd   :  { %p483_p5 = scmp.ne.s32.totalorder %s18_s16, %s482_s27  ;;  %p488_p7 = scmp.lt.s32.totalorder %s482_s27, %s482_s27 }
   0xf   :  { %p489_p8 = por %p488_p7, %p487_p6 }
  0x11   :  { %p490_p9 = pnand %p489_p8, %p483_p5 }
  0x13   :  { %493 = shalt.err (!%p490_p9)
}
  0x14   :  { %s548_s28 = smov 512   ;;  %s549_s29 = smov 256  }
  0x15   :  { %s550_s30 = smov 16   ;;  %s421_s9 = scalar_lea.hbm %s639_s1, 256 }
  0x16   :  { %23 = dma.hbm_to_vmem [thread:$0]  %s638_s0, 512, %s18_s16, [#allocation3], %s548_s28, %s549_s29, %s550_s30  }
  0x17   :  { %s551_s10 = smov [#allocation5]   ;;  %s518_s14 = scalar_lea.hbm %s639_s1, 768 }
  0x18   :  { %s33_s11 = sshll.u32 %s551_s10, 4  ;;  %p495_p10 = scmp.ne.s32.totalorder %s421_s9, %s518_s14  ;;  %s34_s11 = int_to_ptr.vmem [resolvable:$true] %s33_s11 }
  0x19   :  { %s496_s18 = scalar_lea.hbm %s639_s1, 1024  ;;  %p497_p11 = scmp.lt.u32.totalorder %s421_s9, %s639_s1 }
  0x1a   :  { %p498_p12 = scmp.lt.u32.totalorder %s496_s18, %s518_s14  ;;  %p500_p0 = scmp.lt.u32.totalorder %s518_s14, %s421_s9 }
  0x1c   :  { %p499_p13 = por %p498_p12, %p497_p11 }
  0x1e   :  { %p501_p1 = por %p500_p0, %p499_p13 }
  0x20   :  { %p502_p2 = pnand %p501_p1, %p495_p10 }
  0x22   :  { %505 = shalt.err (!%p502_p2)
}
  0x23   :  { %s506_s0 = scalar_lea.vmem %s34_s11, 512  ;;  %p511_p4 = scmp.lt.s32.totalorder %s34_s11, %s34_s11 }
  0x24   :  { %p507_p3 = scmp.ne.s32.totalorder %s34_s11, %s506_s0  ;;  %p512_p5 = scmp.lt.s32.totalorder %s506_s0, %s506_s0 }
  0x26   :  { %p513_p6 = por %p512_p5, %p511_p4 }
  0x28   :  { %p514_p7 = pnand %p513_p6, %p507_p3 }
  0x2a   :  { %517 = shalt.err (!%p514_p7)
}
  0x2b   :  { %39 = dma.hbm_to_vmem [thread:$0]  %s421_s9, 512, %s34_s11, [#allocation6], %s548_s28, %s549_s29, %s550_s30  }
  0x2c   :  { %541 = dma.done.wait [#allocation3], 512  }
  0x2d   :  { %542 = vsyncadd [#allocation3], 4294966784 }
  0x2e   :  { %543 = dma.done.wait [#allocation6], 512  }
  0x2f   :  { %544 = vsyncadd [#allocation6], 4294966784  ;;  %v552_v0 = vmov 0   ;;  %v465_v1 = vld [vmem:[#allocation2 + $0xc] ss:$16 sps:$4 sm:$0xff]   ;;  %s553_s1 = smov 127  }
  0x30   :  { %168 = vmatprep.mubr.bf16.mxu1 %v552_v0  ;;  %127 = vmatprep.mubr.bf16.mxu0 %v552_v0  ;;  %v467_v2 = vld [vmem:[#allocation2 + $0x4] ss:$16 sps:$4 sm:$0xff]   ;;  %v469_v3 = vld [vmem:[#allocation5] ss:$16 sps:$4 sm:$0xff]   ;;  %v470_v4 = vld [vmem:[#allocation2 + $0x8] ss:$16 sps:$4 sm:$0xff]  }
  0x31   :  { %464 = vset.pattern.permute.xlu0 %v552_v0  ;;  %189 = vrot.lane.b32.xlu1 %v465_v1, %s553_s1  ;;  %v471_v5 = vld [vmem:[#allocation2] ss:$16 sps:$4 sm:$0xff]   ;;  %vm91_vm0 = vcmask 130048   ;;  %s554_s22 = smov 126   ;;  %vm193_vm1 = vcmask 1039360   ;;  %vm303_vm2 = vcmask 1031168  }
  0x32   :  { %136 = vmatprep.subr.bf16.mxu1 %v465_v1  ;;  %185 = vrot.lane.b32.xlu0 %v467_v2, %s553_s1  ;;  %v90_v6 = vld [vmem:[%s640_s2] sm:$0xf]  ;;  %v429_v15 = vld [vmem:[%s640_s2 + $0x4] sm:$0xf]  ;;  %v432_v27 = vld [vmem:[%s640_s2 + $0x8] sm:$0xf] }
  0x33   :  { %95 = vmatprep.subr.bf16.mxu0 %v467_v2  ;;  %137 = vmatpush1.bf16.msra.mxu1 %v470_v4  ;;  %v84_v7 = vld [vmem:[%s641_s3] sm:$0xff]  ;;  %s555_s28 = smov [#allocation7]  }
  0x34   :  { %96 = vmatpush1.bf16.msra.mxu0 %v471_v5  ;;  %s411_s29 = sshll.u32 %s555_s28, 4  ;;  %s412_s29 = int_to_ptr.vmem [resolvable:$true] %s411_s29 }
  0x35   :  { %191 = vrot.lane.b32.xlu1 %v469_v3, %s553_s1  ;;  %s519_s2 = scalar_lea.vmem %s412_s29, 512  ;;  %p524_p9 = scmp.lt.s32.totalorder %s412_s29, %s412_s29 }
  0x36   :  { %187 = vrot.lane.b32.xlu0 %v470_v4, %s553_s1  ;;  %428 = vmatmul.mubr.msk.bf16.vlgmr.msra.gmra.mrb[0].mxu1 %vm91_vm0, %v90_v6  ;;  %p520_p8 = scmp.ne.s32.totalorder %s412_s29, %s519_s2  ;;  %p525_p10 = scmp.lt.s32.totalorder %s519_s2, %s519_s2 }
  0x37   :  { %427 = vmatmul.mubr.msk.bf16.vlgmr.msra.gmra.mrb[0].mxu0 %vm91_vm0, %v90_v6  ;;  %278 = vmatprep.mubr.bf16.mxu1 %v552_v0 }
  0x38   :  { %237 = vmatprep.mubr.bf16.mxu0 %v552_v0  ;;  %p526_p11 = por %p525_p10, %p524_p9 }
  0x39   :  { %295 = vrot.lane.b32.xlu1 %v467_v2, %s554_s22 }
  0x3a   :  { %183 = vrot.lane.b32.xlu0 %v471_v5, %s553_s1  ;;  %p527_p12 = pnand %p526_p11, %p520_p8 }
  0x3d   :  { %299 = vrot.lane.b32.xlu1 %v465_v1, %s554_s22 }
  0x3e   :  { %297 = vrot.lane.b32.xlu0 %v470_v4, %s554_s22 }
  0x41   :  { %293 = vrot.lane.b32.xlu1 %v471_v5, %s554_s22 }
  0x42   :  { %301 = vrot.lane.b32.xlu0 %v469_v3, %s554_s22 }
  0x46   :  { %87 = vperm.xlu0 %464, %v84_v7  }
  0xa3   :  { %v190_v8 = vpop.permute.xlu1 %189 }
  0xa4   :  { %v186_v9 = vpop.permute.xlu0 %185 }
  0xa7   :  { %v192_v10 = vpop.permute.xlu1 %191 }
  0xa8   :  { %v188_v11 = vpop.permute.xlu0 %187  ;;  %v197_v12 = vsel %vm193_vm1, %v190_v8, %v192_v10 }
  0xa9   :  { %v196_v13 = vsel %vm193_vm1, %v188_v11, %v190_v8  ;;  %v195_v14 = vsel %vm193_vm1, %v186_v9, %v188_v11  ;;  %246 = vmatprep.subr.bf16.mxu1 %v197_v12 }
  0xaa   :  { %205 = vmatprep.subr.bf16.mxu0 %v195_v14  ;;  %247 = vmatpush1.bf16.msra.mxu1 %v196_v13 }
  0xab   :  { %v296_v16 = vpop.permute.xlu1 %295 }
  0xac   :  { %v184_v17 = vpop.permute.xlu0 %183 }
  0xad   :  { %v194_v18 = vsel %vm193_vm1, %v184_v17, %v186_v9  ;;  %431 = vmatmul.mubr.msk.bf16.vlgmr.msra.gmra.mrb[0].mxu1 %vm91_vm0, %v429_v15 }
  0xae   :  { %206 = vmatpush1.bf16.msra.mxu0 %v194_v18  ;;  %388 = vmatprep.mubr.bf16.mxu1 %v552_v0 }
  0xaf   :  { %v300_v19 = vpop.permute.xlu1 %299 }
  0xb0   :  { %v298_v20 = vpop.permute.xlu0 %297 }
  0xb1   :  { %430 = vmatmul.mubr.msk.bf16.vlgmr.msra.gmra.mrb[0].mxu0 %vm91_vm0, %v429_v15  ;;  %v305_v21 = vsel %vm303_vm2, %v296_v16, %v298_v20  ;;  %v306_v26 = vsel %vm303_vm2, %v298_v20, %v300_v19 }
  0xb2   :  { %315 = vmatprep.subr.bf16.mxu0 %v305_v21  ;;  %347 = vmatprep.mubr.bf16.mxu0 %v552_v0 }
  0xb3   :  { %v294_v22 = vpop.permute.xlu1 %293 }
  0xb4   :  { %v304_v23 = vsel %vm303_vm2, %v294_v22, %v296_v16  ;;  %v302_v24 = vpop.permute.xlu0 %301 }
  0xb5   :  { %316 = vmatpush1.bf16.msra.mxu0 %v304_v23  ;;  %v307_v25 = vsel %vm303_vm2, %v300_v19, %v302_v24 }
  0xb6   :  { %356 = vmatprep.subr.bf16.mxu1 %v307_v25 }
  0xb7   :  { %357 = vmatpush1.bf16.msra.mxu1 %v306_v26 }
  0xba   :  { %434 = vmatmul.mubr.msk.bf16.vlgmr.msra.gmra.mrb[0].mxu1 %vm91_vm0, %v432_v27 }
  0xbd   :  { %433 = vmatmul.mubr.msk.bf16.vlgmr.msra.gmra.mrb[0].mxu0 %vm91_vm0, %v432_v27 }
  0xc5   :  { %v88_v28 = vpop.permute.xlu0 %87 }
 0x18d   :  { %v390_v29 = vpop.f32.mrb[0].mxu1 }
 0x18e   :  { %v437_v30 = vadd.f32 %v390_v29, %v88_v28  ;;  %v392_v31 = vpop.f32.mrb[1].mxu1 }
 0x18f   :  { %v438_v32 = vadd.f32 %v392_v31, %v88_v28  ;;  %v394_v33 = vpop.f32.mrb[2].mxu1 }
 0x190   :  { %403 = vst [vmem:[#allocation7 + $0x10] sm:$0xff] %v437_v30  ;;  %v349_v34 = vpop.f32.mrb[0].mxu0  ;;  %v395_v35 = vpop.f32.mrb[3].mxu1 }
 0x191   :  { %404 = vst [vmem:[#allocation7 + $0x18] sm:$0xff] %v438_v32  ;;  %v435_v36 = vadd.f32 %v349_v34, %v88_v28  ;;  %v351_v37 = vpop.f32.mrb[1].mxu0 }
 0x192   :  { %v436_v38 = vadd.f32 %v351_v37, %v88_v28  ;;  %v353_v39 = vpop.f32.mrb[2].mxu0 }
 0x193   :  { %401 = vst [vmem:[#allocation7] sm:$0xff] %v435_v36  ;;  %v354_v40 = vpop.f32.mrb[3].mxu0 }
 0x194   :  { %402 = vst [vmem:[#allocation7 + $0x8] sm:$0xff] %v436_v38 }
 0x195   :  { %530 = shalt.err (!%p527_p12)
}
 0x196   :  { %s531_s6 = scalar_lea.hbm %s642_s4, 512 }
 0x197   :  { %p532_p13 = scmp.ne.s32.totalorder %s642_s4, %s531_s6  ;;  %p535_p0 = scmp.lt.u32.totalorder %s531_s6, %s642_s4 }
 0x199   :  { %p537_p1 = pnand %p535_p0, %p532_p13 }
 0x19b   :  { %540 = shalt.err (!%p537_p1)
}
 0x19c   :  { %414 = dma.vmem_to_hbm [thread:$0]  %s412_s29, 512, %s642_s4, [#allocation4]  }
 0x19d   :  { %545 = dma.done.wait [#allocation4], 512  }
 0x19e   :  { %546 = vsyncadd [#allocation4], 4294966784 }
 0x19f   :  { %418 = vsyncpa [#allocation3], 1 }
 0x1a0   :  { %419 = vsyncpa [#allocation6], 1 }
 0x1a1   :  { %420 = vsyncpa [#allocation4], 1 }

</bundles_post_ra>
